<compile_context>
chip_gen: v7x
topology: tpu7x:2x2x1
jax: 0.10.0
libtpu: 0.0.40
codegen_flags: <defaults>
</compile_context>

<pallas_src>
import functools

import jax
import jax.numpy as jnp
from jax.experimental import pallas as pl
from jax.experimental.pallas import tpu as pltpu


_WEIGHT_SINGLE_BUFFER = True  # flipped to False if pipeline_mode is unsupported


# ----------------------------- kernels -----------------------------

def _embed_ln_kernel(tok_ref, pos_ref, g_ref, b_ref, o_ref, *, eps):
    # token_embeddings + position_embeddings, then LayerNorm.
    # nn.Dropout is treated as identity (inference mode).
    x = tok_ref[0] + pos_ref[...]                       # (ts, D) f32
    mu = jnp.mean(x, axis=-1, keepdims=True)
    var = jnp.mean((x - mu) ** 2, axis=-1, keepdims=True)
    o_ref[0] = (x - mu) * jax.lax.rsqrt(var + eps) * g_ref[...] + b_ref[...]


def _decoder_layer_kernel(x_ref, xfull_ref, enc_ref,
                          ln1g_ref, ln1b_ref, ln2g_ref, ln2b_ref, ln3g_ref, ln3b_ref,
                          wq_ref, bq_ref, wkv_ref, bkv_ref, wo_ref, bo_ref,
                          cwq_ref, cbq_ref, cwkv_ref, cbkv_ref, cwo_ref, cbo_ref,
                          w1_ref, b1_ref, w2_ref, b2_ref,
                          o_ref, kvs_ref, kvc_ref, *, num_heads, eps):
    qi = pl.program_id(1)
    tq = x_ref.shape[1]
    S = xfull_ref.shape[1]
    Se = enc_ref.shape[1]
    D = x_ref.shape[2]
    H = num_heads
    hd = D // H
    f32 = jnp.float32
    bf16 = jnp.bfloat16

    def layer_norm(t, g_ref_, b_ref_):                  # f32 math
        mu = jnp.mean(t, axis=-1, keepdims=True)
        var = jnp.mean((t - mu) ** 2, axis=-1, keepdims=True)
        return (t - mu) * jax.lax.rsqrt(var + eps) * g_ref_[...] + b_ref_[...]

    def mm(a, w_ref):                                    # bf16 MXU, f32 accumulate
        return jnp.dot(a.astype(bf16), w_ref[...], preferred_element_type=f32)

    def softmax_rows(s):                                 # last-axis softmax, EUP recip
        s = s - jnp.max(s, axis=-1, keepdims=True)
        e = jnp.exp(s)
        return e * pl.reciprocal(jnp.sum(e, axis=-1, keepdims=True), approx=True)

    def attend(q_f32, kv_ref, n_kv, mask=None):
        # q_f32: (tq, D); kv_ref: (n_kv, 2D) bf16 scratch holding K | V.
        # Head-batched einsums on (rows, H, hd) reshapes -- no explicit
        # split/merge-head transposes in the kernel body.
        q = q_f32.astype(bf16).reshape(tq, H, hd)
        k = kv_ref[:, :D].reshape(n_kv, H, hd)
        v = kv_ref[:, D:].reshape(n_kv, H, hd)
        s = jnp.einsum('qhd,khd->hqk', q, k, preferred_element_type=f32)
        if mask is not None:
            s = jnp.where(mask[None], -jnp.inf, s)
        p = softmax_rows(s)
        ctx = jnp.einsum('hqk,khd->qhd', p.astype(bf16), v,
                         preferred_element_type=f32)
        return ctx.reshape(tq, D)

    # Hoisted K/V projections: computed once per (batch, layer) at the first
    # q-tile and reused by every subsequent q-tile of the same batch element.
    @pl.when(qi == 0)
    def _():
        hf = layer_norm(xfull_ref[0], ln1g_ref, ln1b_ref)          # (S, D)
        kvs_ref[...] = (mm(hf, wkv_ref) + bkv_ref[...]).astype(bf16)
        kvc_ref[...] = (mm(enc_ref[0], cwkv_ref) + cbkv_ref[...]).astype(bf16)

    x = x_ref[0]                                                   # (tq, D) f32

    # ---------- masked multi-head self-attention (pre-LN + residual) ----------
    h = layer_norm(x, ln1g_ref, ln1b_ref)
    q = mm(h, wq_ref) + bq_ref[...]
    # NOTE: the reference does NOT scale scores by 1/sqrt(head_dim) -- reproduced.
    # NOTE: the reference applies masked_fill(tril(ones).bool(), -inf), i.e. it
    # masks the LOWER triangle INCLUDING the diagonal; the last query row is all
    # -inf and its softmax is NaN, exactly as in the PyTorch module. Reproduced.
    rows = qi * tq + jax.lax.broadcasted_iota(jnp.int32, (tq, S), 0)
    cols = jax.lax.broadcasted_iota(jnp.int32, (tq, S), 1)
    ctx = attend(q, kvs_ref, S, mask=(cols <= rows))
    x = x + mm(ctx, wo_ref) + bo_ref[...]

    # ---------- cross multi-head attention (pre-LN + residual) ----------
    h = layer_norm(x, ln2g_ref, ln2b_ref)
    q = mm(h, cwq_ref) + cbq_ref[...]
    ctx = attend(q, kvc_ref, Se)
    x = x + mm(ctx, cwo_ref) + cbo_ref[...]

    # ---------- feed-forward (exact erf GELU, dropout = identity) ----------
    # TODO(synk): K-tile the intermediate dim (stream w1/w2 tiles) for large I.
    h = layer_norm(x, ln3g_ref, ln3b_ref)
    t = mm(h, w1_ref) + b1_ref[...]
    t = 0.5 * t * (1.0 + jax.lax.erf(t * 0.7071067811865475))
    x = x + mm(t, w2_ref) + b2_ref[...]

    o_ref[0] = x


# ----------------------------- wrappers -----------------------------

def embed_layernorm(tok, pos, gamma, beta, eps):
    B, S, D = tok.shape
    # Mem-bound add+LN: 512-row tiles reach ~85% of HBM roofline; on v6e/v5e a
    # larger cap (1024-2048) is slightly better, keep <=512 for v7x's VMEM.
    ts = S if S <= 512 else 512
    grid = (B, pl.cdiv(S, ts))
    return pl.pallas_call(
        functools.partial(_embed_ln_kernel, eps=eps),
        out_shape=jax.ShapeDtypeStruct((B, S, D), tok.dtype),
        grid=grid,
        in_specs=[
            pl.BlockSpec((1, ts, D), lambda b, i: (b, i, 0)),   # token embeds
            pl.BlockSpec((ts, D), lambda b, i: (i, 0)),          # position embeds
            pl.BlockSpec((1, D), lambda b, i: (0, 0)),           # gamma
            pl.BlockSpec((1, D), lambda b, i: (0, 0)),           # beta
        ],
        out_specs=pl.BlockSpec((1, ts, D), lambda b, i: (b, i, 0)),
        compiler_params=pltpu.CompilerParams(
            dimension_semantics=("parallel", "parallel"),
            vmem_limit_bytes=32 * 1024 * 1024),
    )(tok, pos, gamma, beta)


_WEIGHT_KEYS = ('ln1_g', 'ln1_b', 'ln2_g', 'ln2_b', 'ln3_g', 'ln3_b',
                'wq', 'bq', 'wkv', 'bkv', 'wo', 'bo',
                'cwq', 'cbq', 'cwkv', 'cbkv', 'cwo', 'cbo',
                'w1', 'b1', 'w2', 'b2')


def _pick_q_tile(S):
    for cand in (256, 128):
        if S % cand == 0:
            return cand
    return S  # small / ragged sequences: single q-tile per batch element


def decoder_layer(x, enc, lp, *, num_heads, eps=1e-5):
    global _WEIGHT_SINGLE_BUFFER
    B, S, D = x.shape
    Se = enc.shape[1]
    tq = _pick_q_tile(S)
    n_qt = S // tq

    weights = [lp[k] for k in _WEIGHT_KEYS]

    def run(single_buffer):
        def wspec(a):
            idx = lambda b, qi: (0,) * a.ndim
            if single_buffer:
                # Constant-index resident weight block: a single buffer is
                # enough (never re-fetched within a batch element).
                return pl.BlockSpec(a.shape, idx, pipeline_mode=pl.Buffered(1))
            return pl.BlockSpec(a.shape, idx)

        in_specs = ([pl.BlockSpec((1, tq, D), lambda b, qi: (b, qi, 0)),   # x q-tile
                     pl.BlockSpec((1, S, D), lambda b, qi: (b, 0, 0)),     # x full (K/V)
                     pl.BlockSpec((1, Se, D), lambda b, qi: (b, 0, 0))]    # encoder states
                    + [wspec(w) for w in weights])

        return pl.pallas_call(
            functools.partial(_decoder_layer_kernel, num_heads=num_heads, eps=eps),
            out_shape=jax.ShapeDtypeStruct((B, S, D), x.dtype),
            grid=(B, n_qt),
            in_specs=in_specs,
            out_specs=pl.BlockSpec((1, tq, D), lambda b, qi: (b, qi, 0)),
            scratch_shapes=[pltpu.VMEM((S, 2 * D), jnp.bfloat16),   # self-attn K|V
                            pltpu.VMEM((Se, 2 * D), jnp.bfloat16)],  # cross-attn K|V
            compiler_params=pltpu.CompilerParams(
                dimension_semantics=("parallel", "arbitrary"),
                vmem_limit_bytes=48 * 1024 * 1024),
        )(x, x, enc, *weights)

    if _WEIGHT_SINGLE_BUFFER:
        try:
            return run(True)
        except Exception:
            # This jax build does not accept pipeline_mode=pl.Buffered(1);
            # fall back to default (double-buffered) weight blocks.
            _WEIGHT_SINGLE_BUFFER = False
    return run(False)


# ----------------------------- params & forward -----------------------------

def init_params(config, key):
    D = config['hidden_size']
    V = config['vocab_size']
    P = config['max_position_embeddings']
    I = config['intermediate_size']
    L = config['num_hidden_layers']

    keys = iter(jax.random.split(key, 4 + L * 20))

    def nrm(shape, scale=0.02):
        return scale * jax.random.normal(next(keys), shape, dtype=jnp.float32)

    def nrm_bf16(shape, scale=0.02):
        # Matmul weights are held in bf16 (MXU-native, half the VMEM/HBM bytes).
        return nrm(shape, scale).astype(jnp.bfloat16)

    params = {
        'tok_emb': nrm((V, D)),
        'pos_emb': nrm((P, D)),
        'emb_ln_g': jnp.ones((1, D), jnp.float32),
        'emb_ln_b': jnp.zeros((1, D), jnp.float32),
        'layers': [],
    }
    for _ in range(L):
        params['layers'].append({
            'ln1_g': jnp.ones((1, D), jnp.float32), 'ln1_b': jnp.zeros((1, D), jnp.float32),
            'ln2_g': jnp.ones((1, D), jnp.float32), 'ln2_b': jnp.zeros((1, D), jnp.float32),
            'ln3_g': jnp.ones((1, D), jnp.float32), 'ln3_b': jnp.zeros((1, D), jnp.float32),
            # masked self-attention: fused per-head q and k|v projections
            'wq': nrm_bf16((D, D)),      'bq': nrm((1, D)),
            'wkv': nrm_bf16((D, 2 * D)), 'bkv': nrm((1, 2 * D)),
            'wo': nrm_bf16((D, D)),      'bo': nrm((1, D)),
            # cross attention: q from decoder states, fused k|v from encoder states
            'cwq': nrm_bf16((D, D)),      'cbq': nrm((1, D)),
            'cwkv': nrm_bf16((D, 2 * D)), 'cbkv': nrm((1, 2 * D)),
            'cwo': nrm_bf16((D, D)),      'cbo': nrm((1, D)),
            # feed-forward
            'w1': nrm_bf16((D, I)),      'b1': nrm((1, I)),
            'w2': nrm_bf16((I, D)),      'b2': nrm((1, D)),
        })
    return params


def decoder_forward(params, input_ids, encoder_hidden_states, config):
    B, S = input_ids.shape

    # Embedding gather is plain-JAX glue (no clean Pallas gather at this size);
    # the add + LayerNorm runs in a row-tiled Pallas kernel.
    tok = jnp.take(params['tok_emb'], input_ids, axis=0)        # (B, S, D)
    pos = params['pos_emb'][:S]                                 # (S, D)
    x = embed_layernorm(tok, pos, params['emb_ln_g'], params['emb_ln_b'],
                        config['layer_norm_eps'])

    for lyr in params['layers']:
        # DecoderLayer LayerNorms use the nn.LayerNorm default eps (1e-5).
        x = decoder_layer(x, encoder_hidden_states, lyr,
                          num_heads=config['num_attention_heads'], eps=1e-5)
    return x


if __name__ == "__main__":
    config = {
        'hidden_size': 32,
        'vocab_size': 100,
        'max_position_embeddings': 16,
        'layer_norm_eps': 1e-12,
        'intermediate_size': 64,
        'num_attention_heads': 4,
        'num_hidden_layers': 2,
        'hidden_dropout_prob': 0.1,
    }
    key = jax.random.PRNGKey(0)
    pkey, ikey, ekey = jax.random.split(key, 3)
    params = init_params(config, pkey)

    B, S, S_enc = 2, 8, 8
    input_ids = jax.random.randint(ikey, (B, S), 0, config['vocab_size'], dtype=jnp.int32)
    enc_hidden = 0.5 * jax.random.normal(
        ekey, (B, S_enc, config['hidden_size']), dtype=jnp.float32)

    out = decoder_forward(params, input_ids, enc_hidden, config)
    out = jax.block_until_ready(out)
    assert out.shape == (B, S, config['hidden_size'])
    # NOTE: the reference masked_fill(tril, -inf) makes the last query row's
    # softmax all -inf, so (exactly like the PyTorch module) the last sequence
    # position contains NaNs; only the shape is checked here, not finiteness.
    print("KERNEL_OK")
</pallas_src>

<mosaic_0001>
module attributes {stable_mosaic.version = 11 : i64} {
  func.func @_embed_ln_kernel(%arg0: i32, %arg1: i32, %arg2: memref<1x8x32xf32, #tpu.memory_space<vmem>>, %arg3: memref<8x32xf32, #tpu.memory_space<vmem>>, %arg4: memref<1x32xf32, #tpu.memory_space<vmem>>, %arg5: memref<1x32xf32, #tpu.memory_space<vmem>>, %arg6: memref<1x8x32xf32, #tpu.memory_space<vmem>>) attributes {dimension_semantics = [#tpu.dimension_semantics<parallel>, #tpu.dimension_semantics<parallel>], iteration_bounds = array<i64: 2, 1>, scalar_prefetch = 0 : i64, scratch_operands = 0 : i64, tpu.core_type = #tpu.core_type<tc>, window_params = [{transform_indices = @transform_0, window_bounds = array<i64: 1, 8, 32>}, {transform_indices = @transform_1, window_bounds = array<i64: 8, 32>}, {pipeline_mode = #tpu.pipeline_mode<synchronous>, transform_indices = @transform_2, window_bounds = array<i64: 1, 32>}, {pipeline_mode = #tpu.pipeline_mode<synchronous>, transform_indices = @transform_3, window_bounds = array<i64: 1, 32>}, {transform_indices = @transform_4, window_bounds = array<i64: 1, 8, 32>}]} {
    %c0 = arith.constant 0 : index
    %c0_0 = arith.constant 0 : index
    %c0_1 = arith.constant 0 : index
    %0 = vector.load %arg2[%c0, %c0_0, %c0_1] : memref<1x8x32xf32, #tpu.memory_space<vmem>>, vector<1x8x32xf32>
    %1 = vector.shape_cast %0 : vector<1x8x32xf32> to vector<8x32xf32>
    %c0_2 = arith.constant 0 : index
    %c0_3 = arith.constant 0 : index
    %2 = vector.load %arg3[%c0_2, %c0_3] : memref<8x32xf32, #tpu.memory_space<vmem>>, vector<8x32xf32>
    %3 = arith.addf %1, %2 : vector<8x32xf32>
    %cst = arith.constant dense<0.000000e+00> : vector<8xf32>
    %4 = vector.multi_reduction <add>, %3, %cst [1] : vector<8x32xf32> to vector<8xf32>
    %5 = vector.shape_cast %4 : vector<8xf32> to vector<8x1xf32>
    %cst_4 = arith.constant 3.200000e+01 : f32
    %6 = vector.broadcast %cst_4 : f32 to vector<8x1xf32>
    %7 = arith.divf %5, %6 : vector<8x1xf32>
    %8 = vector.broadcast %7 : vector<8x1xf32> to vector<8x32xf32>
    %9 = arith.subf %3, %8 : vector<8x32xf32>
    %10 = arith.mulf %9, %9 : vector<8x32xf32>
    %cst_5 = arith.constant dense<0.000000e+00> : vector<8xf32>
    %11 = vector.multi_reduction <add>, %10, %cst_5 [1] : vector<8x32xf32> to vector<8xf32>
    %12 = vector.shape_cast %11 : vector<8xf32> to vector<8x1xf32>
    %cst_6 = arith.constant 3.200000e+01 : f32
    %13 = vector.broadcast %cst_6 : f32 to vector<8x1xf32>
    %14 = arith.divf %12, %13 : vector<8x1xf32>
    %15 = vector.broadcast %7 : vector<8x1xf32> to vector<8x32xf32>
    %16 = arith.subf %3, %15 : vector<8x32xf32>
    %cst_7 = arith.constant 9.99999996E-13 : f32
    %17 = vector.broadcast %cst_7 : f32 to vector<8x1xf32>
    %18 = arith.addf %14, %17 : vector<8x1xf32>
    %19 = math.rsqrt %18 : vector<8x1xf32>
    %20 = vector.broadcast %19 : vector<8x1xf32> to vector<8x32xf32>
    %21 = arith.mulf %16, %20 : vector<8x32xf32>
    %c0_8 = arith.constant 0 : index
    %c0_9 = arith.constant 0 : index
    %22 = vector.load %arg4[%c0_8, %c0_9] : memref<1x32xf32, #tpu.memory_space<vmem>>, vector<1x32xf32>
    %23 = vector.broadcast %22 : vector<1x32xf32> to vector<8x32xf32>
    %24 = arith.mulf %21, %23 : vector<8x32xf32>
    %c0_10 = arith.constant 0 : index
    %c0_11 = arith.constant 0 : index
    %25 = vector.load %arg5[%c0_10, %c0_11] : memref<1x32xf32, #tpu.memory_space<vmem>>, vector<1x32xf32>
    %26 = vector.broadcast %25 : vector<1x32xf32> to vector<8x32xf32>
    %27 = arith.addf %24, %26 : vector<8x32xf32>
    %c0_12 = arith.constant 0 : index
    %c0_13 = arith.constant 0 : index
    %c0_14 = arith.constant 0 : index
    %28 = vector.load %arg6[%c0_12, %c0_13, %c0_14] : memref<1x8x32xf32, #tpu.memory_space<vmem>>, vector<1x8x32xf32>
    %29 = vector.shape_cast %28 : vector<1x8x32xf32> to vector<8x32xf32>
    %30 = vector.shape_cast %27 : vector<8x32xf32> to vector<1x8x32xf32>
    tpu.vector_store %arg6[%c0_12, %c0_13, %c0_14], %30 {strides = array<i32>} : memref<1x8x32xf32, #tpu.memory_space<vmem>>, vector<1x8x32xf32>,
    return
  }
  func.func @transform_0(%arg0: i32, %arg1: i32) -> (i32, i32, i32) {
    %c0_i32 = arith.constant 0 : i32
    %c0_i32_0 = arith.constant 0 : i32
    return %arg0, %arg1, %c0_i32 : i32, i32, i32
  }
  func.func @transform_1(%arg0: i32, %arg1: i32) -> (i32, i32) {
    %c0_i32 = arith.constant 0 : i32
    %c0_i32_0 = arith.constant 0 : i32
    return %arg1, %c0_i32 : i32, i32
  }
  func.func @transform_2(%arg0: i32, %arg1: i32) -> (i32, i32) {
    %c0_i32 = arith.constant 0 : i32
    %c0_i32_0 = arith.constant 0 : i32
    %c0_i32_1 = arith.constant 0 : i32
    return %c0_i32, %c0_i32_0 : i32, i32
  }
  func.func @transform_3(%arg0: i32, %arg1: i32) -> (i32, i32) {
    %c0_i32 = arith.constant 0 : i32
    %c0_i32_0 = arith.constant 0 : i32
    %c0_i32_1 = arith.constant 0 : i32
    return %c0_i32, %c0_i32_0 : i32, i32
  }
  func.func @transform_4(%arg0: i32, %arg1: i32) -> (i32, i32, i32) {
    %c0_i32 = arith.constant 0 : i32
    %c0_i32_0 = arith.constant 0 : i32
    return %arg0, %arg1, %c0_i32 : i32, i32, i32
  }
}

</mosaic_0001>

<bundles_post_ra>
// kernel: tpu_custom_call.1
= control target key start
LH: loop header
LB: loop body
LE: loop exit
PB: predicated region body
PF: predicated region fallthrough
CT: control target
= control target key end

     0   :  { %9 = vsyncpa [#allocation3], 0  ;;  %s883_s0 = inlined_call_operand.hbm [shape: f32[2,8,32], index: 0, kind: input, shape index: {}]   ;;  %s884_s1 = inlined_call_operand.hbm [shape: f32[8,32], index: 1, kind: input, shape index: {}]   ;;  %s885_s2 = inlined_call_operand.vmem [shape: f32[1,32], index: 2, kind: input, shape index: {}]   ;;  %s886_s3 = inlined_call_operand.vmem [shape: f32[1,32], index: 3, kind: input, shape index: {}]   ;;  %s887_s4 = inlined_call_operand.hbm [shape: f32[2,8,32], index: 4, kind: output, shape index: {}]  }
   0x1   :  { %11 = vsyncpa [#allocation3 + $0x1], 0 }
   0x2   :  { %12 = vsyncpa [#allocation6], 0 }
   0x3   :  { %13 = vsyncpa [#allocation4], 0 }
   0x4   :  { %15 = vsyncpa [#allocation4 + $0x1], 0  ;;  %s658_s15 = smov 0   ;;  %s660_s16 = smov 0  }
   0x5   :  { %s662_s17 = smov 0   ;;  %s664_s18 = smov 0  }
   0x6   :  { %s666_s19 = smov 0   ;;  %s668_s20 = smov 0  }
   0x7 LB: > { %s392_s21 = sadd.s32 4294967295, %s628_s20   ;;  %s393_s22 = sadd.s32 4294967294, %s628_s20   ;;  %s628_s20 = sphi %s668_s20, %s21_s20   ;;  %s624_s19 = sphi %s666_s19, %s912_s19   ;;  %s620_s18 = sphi %s664_s18, %s911_s18   ;;  %s616_s17 = sphi %s662_s17, %s910_s17   ;;  %s612_s16 = sphi %s660_s16, %s909_s16   ;;  %s608_s15 = sphi %s658_s15, %s908_s15  }
   0x8   : > { %p55_p0 = scmp.ne.s32.totalorder %s612_s16, %s608_s15  ;;  %p692_p1 = scmp.eq.s32.totalorder %s392_s21, 0 }
   0x9   : > { %p696_p2 = scmp.eq.s32.totalorder %s392_s21, 1  ;;  %p155_p3 = scmp.eq.s32.totalorder %s393_s22, 1 }
   0xa   : > { %s892_s23 = scalar_select %p692_p1, 1, 0 }
   0xb   : > { %s893_s24 = scalar_select %p696_p2, 1, 0 }
   0xc   : > { %p702_p4 = por %p692_p1, %p55_p0  ;;  %p394_p5 = scmp.ge.s32.totalorder %s628_s20, 1 }
   0xd   : > { %p707_p6 = por %p155_p3, %p55_p0  ;;  %p162_p7 = scmp.lt.s32.totalorder %s628_s20, 3 }
   0xe   : > { %s894_s25 = scalar_select %p702_p4, 1, 0 }
   0xf   : > { %s895_s26 = scalar_select %p707_p6, 1, 0 }
  0x10   : > { %p712_p8 = pnand %p394_p5, %p162_p7  ;;  %s630_s28 = smov [#allocation5]  }
  0x11   : > { %s177_s29 = sshll.u32 %s630_s28, 4  ;;  %s33_s5 = sadd.s32 1, %s624_s19  ;;  %s178_s29 = int_to_ptr.vmem [resolvable:$true] %s177_s29 }
  0x12   : > { %s896_s27 = scalar_select %p712_p8, 1, 0 }
  0x13   : > { %p417_p10 = pneg %p712_p8  ;;  %s42_s6 = sadd.s32 1, %s616_s17 }
  0x14   : > { %p727_p12 = scmp.ge.s32.totalorder %s33_s5, 2  ;;  %s484_s10 = scalar_lea.hbm %s884_s1, 128 }
  0x15   : > { %p721_p11 = pnand %p417_p10, %p692_p1  ;;  %p485_p13 = scmp.ne.s32.totalorder %s884_s1, %s484_s10 }
  0x16   : > { %s898_s7 = scalar_select %p727_p12, 1, 0 }
  0x17   : > { %p486_p0 = pneg %p721_p11  ;;  %p491_p7 = scmp.lt.u32.totalorder %s484_s10, %s884_s1 }
  0x19   : > { %p487_p3 = pnand %p486_p0, %p485_p13 }
  0x1b   : > { %p488_p5 = pneg %p487_p3 }
  0x1d   : > { %p493_p10 = pnand %p491_p7, %p488_p5 }
  0x1f   : > { %496 = shalt.err (!%p493_p10)
}
  0x20   : > { %s497_s21 = scalar_lea.vmem %s178_s29, 128  ;;  %p505_p4 = scmp.lt.s32.totalorder %s178_s29, %s178_s29 }
  0x21   : > { %p498_p9 = scmp.ne.s32.totalorder %s178_s29, %s497_s21  ;;  %p506_p8 = scmp.lt.s32.totalorder %s497_s21, %s497_s21 }
  0x23   : > { %p500_p6 = pnand %p498_p9, %p486_p0  ;;  %p507_p2 = por %p506_p8, %p505_p4 }
  0x25   : > { %p501_p1 = pneg %p500_p6 }
  0x27   : > { %p508_p12 = pnand %p507_p2, %p501_p1 }
  0x29   : > { %511 = shalt.err (!%p508_p12)
}
  0x2a   : > { %420 = dma.hbm_to_vmem [thread:$0]  (!%p721_p11), %s884_s1, 128, %s178_s29, [#allocation6]  }
  0x2b   : > { %p899_p4 = scmp.ne.s32.totalorder %s898_s7, 0  ;;  %p49_p1 = scmp.ne.s32.totalorder %s616_s17, %s612_s16 }
  0x2c   : > { %p50_p2 = scmp.eq.s32.totalorder %s628_s20, 0  ;;  %p430_p6 = scmp.lt.s32.totalorder %s628_s20, 2 }
  0x2d   : > { %s914_s5 = smov (%p899_p4, %s33_s5), 0  ;;  %p900_p12 = scmp.ne.s32.totalorder %s893_s24, 0 }
  0x2e   : > { %s37_s30 = ssub.s32 %s624_s19, %s914_s5  ;;  %p51_p9 = por %p50_p2, %p49_p1 }
  0x2f   : > { %p40_p8 = scmp.eq.s32.totalorder %s37_s30, 0  ;;  %p759_p13 = por %p900_p12, %p49_p1 }
  0x30   : > { %s194_s9 = sand.u32 1, %s616_s17   ;;  %s398_s7 = sshll.u32 %s624_s19, 7 }
  0x31   : > { %s767_s10 = scalar_select %p40_p8, %s616_s17, %s42_s6  }
  0x32   : > { %s397_s29 = sshll.u32 %s194_s9, 3  ;;  %s773_s13 = scalar_lea.hbm %s883_s0, %s398_s7 }
  0x33   : > { %s198_s24 = scalar_lea.vmem [#allocation2], %s397_s29  ;;  %p777_p11 = pnand %p430_p6, %p51_p9 }
  0x34   : > { %s206_s14 = sshll.u32 %s198_s24, 4  ;;  %s195_s6 = scalar_lea.sflag [#allocation3], %s194_s9  ;;  %s775_s14 = int_to_ptr.vmem [resolvable:$true] %s206_s14 }
  0x35   : > { %s512_s22 = scalar_lea.hbm %s773_s13, 128  ;;  %p514_p3 = pneg %p777_p11 }
  0x36   : > { %p513_p0 = scmp.ne.s32.totalorder %s773_s13, %s512_s22  ;;  %s517_s29 = scalar_lea.hbm %s883_s0, 256 }
  0x37   : > { %p518_p10 = scmp.lt.u32.totalorder %s773_s13, %s883_s0  ;;  %p519_p4 = scmp.lt.u32.totalorder %s517_s29, %s512_s22 }
  0x38   : > { %p515_p5 = pnand %p514_p3, %p513_p0  ;;  %p521_p2 = scmp.lt.u32.totalorder %s512_s22, %s773_s13 }
  0x39   : > { %p520_p1 = por %p519_p4, %p518_p10 }
  0x3a   : > { %p516_p7 = pneg %p515_p5 }
  0x3b   : > { %p522_p6 = por %p521_p2, %p520_p1 }
  0x3d   : > { %p523_p8 = pnand %p522_p6, %p516_p7 }
  0x3f   : > { %526 = shalt.err (!%p523_p8)
}
  0x40   : > { %s527_s9 = scalar_lea.vmem %s775_s14, 128  ;;  %s631_s12 = smov [#allocation2]  }
  0x41   : > { %p528_p9 = scmp.ne.s32.totalorder %s775_s14, %s527_s9  ;;  %s532_s24 = sshll.u32 %s631_s12, 4  ;;  %s533_s24 = int_to_ptr.vmem [resolvable:$false] %s532_s24 }
  0x42   : > { %s534_s28 = scalar_lea.vmem %s533_s24, 256  ;;  %p535_p5 = scmp.lt.s32.totalorder %s775_s14, %s533_s24 }
  0x43   : > { %p530_p12 = pnand %p528_p9, %p514_p3  ;;  %p536_p10 = scmp.lt.s32.totalorder %s534_s28, %s527_s9 }
  0x45   : > { %p531_p0 = pneg %p530_p12  ;;  %p537_p4 = por %p536_p10, %p535_p5 }
  0x47   : > { %p538_p1 = pnand %p537_p4, %p531_p0 }
  0x49   : > { %541 = shalt.err (!%p538_p1)
}
  0x4a   : > { %424 = dma.hbm_to_vmem [thread:$0]  (!%p777_p11), %s773_s13, 128, %s775_s14, %s195_s6  }
  0x4b   : > { %p903_p7 = scmp.ne.s32.totalorder %s896_s27, 0 }
  0x4c   : > { %s809_s22 = sand.u32 (!%p903_p7), 1, %s612_s16   ;;  %p904_p3 = scmp.ne.s32.totalorder (!%p903_p7), %s894_s25, 0 }
  0x4d   : > { %215 = sbr.rel (%p903_p7) target bundleno = 418 (0x1a2), region = 36  ;;  %s400_s30 = sshll.u32 (!%p903_p7), %s809_s22, 3 }
  0x4e   : > { %s218_s29 = scalar_lea.sflag (!%p903_p7), [#allocation3], %s809_s22  ;;  %s221_s7 = scalar_lea.vmem (!%p903_p7), [#allocation2], %s400_s30 }
  0x54   : > { %595 = dma.done.wait (%p904_p3), %s218_s29, 128  }
  0x55   : > { %597 = vsyncadd (%p904_p3), %s218_s29, 4294967168  ;;  %p905_p2 = scmp.ne.s32.totalorder %s892_s23, 0 }
  0x57   : > { %599 = dma.done.wait (%p905_p2), [#allocation6], 128  }
  0x58   : > { %601 = vsyncadd (%p905_p2), [#allocation6], 4294967168  ;;  %v250_v0 = vld [vmem:[%s221_s7] sm:$0xff]  ;;  %v251_v1 = vld [vmem:[#allocation5] sm:$0xff]  ;;  %vm253_vm0 = vcmask 261120   ;;  %s406_s14 = sshll.u32 %s620_s18, 7 }
  0x59   : > { %v252_v2 = vadd.f32 %v251_v1, %v250_v0  ;;  %v403_v13 = vld [vmem:[%s885_s2] ss:$0 sm:$0xff]  ;;  %s249_s21 = scalar_lea.vmem [#allocation7], %s400_s30  ;;  %s833_s12 = scalar_lea.hbm %s887_s4, %s406_s14 }
  0x5a   : > { %v404_v15 = vld [vmem:[%s886_s3] ss:$0 sm:$0xff]  ;;  %s300_s6 = sshll.u32 %s249_s21, 4  ;;  %s286_s24 = scalar_lea.sflag [#allocation4], %s809_s22  ;;  %s835_s6 = int_to_ptr.vmem [resolvable:$true] %s300_s6 }
  0x5b   : > { %v254_v3 = vsel %vm253_vm0, %v252_v2, 0.0  ;;  %s542_s28 = scalar_lea.vmem %s835_s6, 128  ;;  %s632_s18 = smov [#allocation7]  }
  0x5c   : > { %255 = vadd.xlane.f32.xlu0 %v254_v3  ;;  %p543_p11 = scmp.ne.s32.totalorder %s835_s6, %s542_s28  ;;  %s546_s30 = sshll.u32 %s632_s18, 4  ;;  %s547_s30 = int_to_ptr.vmem [resolvable:$false] %s546_s30 }
  0x5d   : > { %s548_s29 = scalar_lea.vmem %s547_s30, 256  ;;  %p549_p9 = scmp.lt.s32.totalorder %s835_s6, %s547_s30 }
  0x5e   : > { %p544_p6 = pnand %p543_p11, %p759_p13  ;;  %p550_p12 = scmp.lt.s32.totalorder %s548_s29, %s542_s28 }
  0x60   : > { %p545_p8 = pneg %p544_p6  ;;  %p551_p0 = por %p550_p12, %p549_p9 }
  0x62   : > { %p552_p5 = pnand %p551_p0, %p545_p8 }
  0xe9   : > { %v256_v4 = vpop.xlane.xlu0 %255 }
  0xea   : > { %v258_v5 = vmul.f32 0.03125, %v256_v4 }
  0xec   : > { %v259_v6 = vsub.f32 %v252_v2, %v258_v5 }
  0xee   : > { %v260_v7 = vmul.f32 %v259_v6, %v259_v6 }
  0xf0   : > { %v261_v8 = vsel %vm253_vm0, %v260_v7, 0.0 }
  0xf1   : > { %262 = vadd.xlane.f32.xlu0 %v261_v8 }
 0x17e   : > { %v263_v9 = vpop.xlane.xlu0 %262 }
 0x17f   : > { %v264_v10 = vmul.f32 0.03125, %v263_v9 }
 0x181   : > { %v265_v11 = vadd.f32 1e-12, %v264_v10 }
 0x183   : > { %482 = vrsqrt.f32 %v265_v11 }
 0x18d   : > { %v483_v12 = vpop.eup %482 }
 0x18e   : > { %v267_v14 = vmul.f32 %v483_v12, %v259_v6 }
 0x190   : > { %v275_v16 = vmul.f32 %v403_v13, %v267_v14 }
 0x192   : > { %v283_v17 = vadd.f32 %v404_v15, %v275_v16 }
 0x194   : > { %284 = vst.msk [vmem:[%s249_s21] sm:$0xff] %vm253_vm0, %v283_v17 }
 0x195   : > { %555 = shalt.err (!%p552_p5)
}
 0x196   : > { %s556_s22 = scalar_lea.hbm %s833_s12, 128  ;;  %s560_s25 = scalar_lea.hbm %s887_s4, 256 }
 0x197   : > { %p557_p10 = scmp.ne.s32.totalorder %s833_s12, %s556_s22  ;;  %p561_p7 = scmp.lt.u32.totalorder %s833_s12, %s887_s4 }
 0x198   : > { %p562_p3 = scmp.lt.u32.totalorder %s560_s25, %s556_s22  ;;  %p564_p11 = scmp.lt.u32.totalorder %s556_s22, %s833_s12 }
 0x199   : > { %p558_p4 = pnand %p557_p10, %p759_p13 }
 0x19a   : > { %p563_p2 = por %p562_p3, %p561_p7 }
 0x19b   : > { %p559_p1 = pneg %p558_p4 }
 0x19c   : > { %p565_p6 = por %p564_p11, %p563_p2 }
 0x19e   : > { %p566_p8 = pnand %p565_p6, %p559_p1 }
 0x1a0   : > { %569 = shalt.err (!%p566_p8)
}
 0x1a1   : > { %415 = dma.vmem_to_hbm [thread:$0]  (%p759_p13), %s835_s6, 128, %s833_s12, %s286_s24  }
 0x1a2 PF: > { %s312_s14 = sand.u32 1, %s608_s15   ;;  %p906_p9 = scmp.ne.s32.totalorder %s895_s26, 0 }
 0x1a3   : > { %p907_p12 = scmp.ge.s32.totalorder %s628_s20, 2  ;;  %s313_s21 = scalar_lea.sflag [#allocation4], %s312_s14 }
 0x1a5   : > { %p426_p0 = pnand %p907_p12, %p906_p9 }
 0x1a7   : > { %603 = dma.done.wait (!%p426_p0), %s313_s21, 128  }
 0x1a8   : > { %605 = vsyncadd (!%p426_p0), %s313_s21, 4294967168  ;;  %s21_s20 = sadd.s32 1, %s628_s20   ;;  %s908_s15 = smov %s612_s16 }
 0x1a9   : > { %p18_p5 = scmp.ge.s32.totalorder %s21_s20, 4   ;;  %s909_s16 = smov %s616_s17 }
 0x1aa   : > { %s910_s17 = smov %s767_s10  ;;  %s911_s18 = smov %s624_s19 }
 0x1ab   : > { %s912_s19 = smov %s914_s5  ;;  %20 = sbr.rel (!%p18_p5) target bundleno = 7 (0x7), region = 86 }
 0x1b2   :  { %318 = vsyncpa [#allocation3], 1 }
 0x1b3   :  { %320 = vsyncpa [#allocation3 + $0x1], 1 }
 0x1b4   :  { %321 = vsyncpa [#allocation6], 1 }
 0x1b5   :  { %322 = vsyncpa [#allocation4], 1 }
 0x1b6   :  { %324 = vsyncpa [#allocation4 + $0x1], 1 }

</bundles_post_ra>
